<compile_context>
chip_gen: v5e
topology: v5e:2x2
jax: 0.10.0
libtpu: 0.0.40
codegen_flags: <defaults>
</compile_context>

<pallas_src>
import functools
import numpy as np

import jax
import jax.numpy as jnp
from jax import lax
from jax.experimental import pallas as pl
from jax.experimental.pallas import tpu as pltpu

LEAKY_SLOPE = 0.01   # torch.nn.LeakyReLU default negative_slope
IN_PAD = 128         # padded (input + autoregressive) feature width; lane 127 = constant 1
H_PAD = 128          # padded hidden width; lane 127 = constant 1 (propagates folded biases)
K_PAD = 128          # single padded lane block holding [logits(k) | mus(k) | stds(k)]


def _fused_ar_kernel(hp_ref, state_ref, gumbel_ref, eps_ref,
                     w1_ref, w2_ref, w3_ref, out_ref,
                     *, bpad, input_size, output_size, k, minimal_std):
    """Whole autoregressive chain in one invocation.

    out_ref is the resident AR state accumulator (bpad, IN_PAD); each head runs a
    3-layer MLP on it, samples its GMM, clips, and writes the sample into column
    input_size + i. HBM writeback happens once, at kernel end.
    """
    out_ref[...] = state_ref[...]

    lane_k = lax.broadcasted_iota(jnp.int32, (bpad, K_PAD), 1)
    lane_in = lax.broadcasted_iota(jnp.int32, (bpad, IN_PAD), 1)
    std_const = jnp.float32(1e-5 + minimal_std)

    # Static unroll over heads: removes all per-head grid/loop overhead and keeps
    # every index static. For large output_size switch to lax.fori_loop here.
    for i in range(output_size):
        mu_coef = hp_ref[4 * i + 0]
        mu_bias = hp_ref[4 * i + 1]
        o_min = hp_ref[4 * i + 2]
        o_max = hp_ref[4 * i + 3]

        # ---- 3-layer MLP; biases live in row 127 of the (bf16) weights, fed by
        #      the constant-1 lane of the state / hidden activations.
        x = out_ref[...]                                                    # (bpad, IN_PAD) f32
        h = jnp.dot(x.astype(jnp.bfloat16), w1_ref[i],
                    preferred_element_type=jnp.float32)
        h = jnp.maximum(h, LEAKY_SLOPE * h)                                 # LeakyReLU (f32 VPU)
        h = jnp.dot(h.astype(jnp.bfloat16), w2_ref[i],
                    preferred_element_type=jnp.float32)
        h = jnp.maximum(h, LEAKY_SLOPE * h)
        o = jnp.dot(h.astype(jnp.bfloat16), w3_ref[i],
                    preferred_element_type=jnp.float32)                     # (bpad, K_PAD)

        # ---- Categorical(logits) via Gumbel-max; noise precomputed outside the kernel.
        scores = jnp.where(lane_k < k, o + gumbel_ref[i], jnp.float32(-1e30))
        row_max = jnp.max(scores, axis=-1, keepdims=True)
        comp = jnp.min(jnp.where(scores >= row_max, lane_k, K_PAD),
                       axis=-1, keepdims=True)                              # (bpad, 1) int32

        # ---- Pick mu/std of the chosen component, draw Normal, clip.
        # sample = mu_sel + (exp(o_sel) + std_const) * eps, fused into ONE
        # cross-lane reduction; exp input is masked to -1e30 off the selected
        # std lane so padded/logit lanes can never overflow into the result.
        eps = eps_ref[i]                                                    # (bpad, 1) f32
        mu_mask = lane_k == comp + k
        std_mask = lane_k == comp + 2 * k
        mus = jnp.tanh(o) * mu_coef + mu_bias
        contrib = (jnp.where(mu_mask, mus, 0.0)
                   + eps * jnp.exp(jnp.where(std_mask, o, jnp.float32(-1e30))))
        sample = jnp.sum(contrib, axis=-1, keepdims=True) + std_const * eps
        sample = jnp.minimum(o_max, jnp.maximum(o_min, sample))             # clip_sample

        # append the clipped sample to the AR state at column input_size + i
        out_ref[...] = jnp.where(lane_in == input_size + i, sample, out_ref[...])


def init_params(key, input_size, output_size, hidden_layers, mixture_count):
    """torch.nn.Linear-style init, stacked per head, biases folded into row 127,
    stored in bfloat16 for the MXU (f32 accumulation in-kernel)."""
    assert len(hidden_layers) == 2, "kernel is specialized to 3 linear layers"
    h1, h2 = hidden_layers
    k = mixture_count
    net_out = 3 * k                                   # per-head output_size == 1
    assert net_out <= K_PAD
    assert h1 < H_PAD and h2 < H_PAD                  # lane 127 reserved for bias constant
    assert input_size + output_size < IN_PAD          # lane 127 reserved for bias constant

    w1s, w2s, w3s = [], [], []
    for i in range(output_size):
        in_dim = input_size + i
        raw = []
        for (fi, fo) in [(in_dim, h1), (h1, h2), (h2, net_out)]:
            key, kw, kb = jax.random.split(key, 3)
            bound = 1.0 / np.sqrt(fi)
            w = jax.random.uniform(kw, (fi, fo), jnp.float32, -bound, bound)
            b = jax.random.uniform(kb, (fo,), jnp.float32, -bound, bound)
            raw.append((w, b))
        (w1, b1), (w2, b2), (w3, b3) = raw

        w1p = (jnp.zeros((IN_PAD, H_PAD), jnp.float32)
               .at[:in_dim, :h1].set(w1)
               .at[IN_PAD - 1, :h1].set(b1)
               .at[IN_PAD - 1, H_PAD - 1].set(1.0))   # propagate constant-1 lane
        w2p = (jnp.zeros((H_PAD, H_PAD), jnp.float32)
               .at[:h1, :h2].set(w2)
               .at[H_PAD - 1, :h2].set(b2)
               .at[H_PAD - 1, H_PAD - 1].set(1.0))
        # torch layout already [logits(k) | mus(k) | stds(k)] at lanes 0..3k
        w3p = (jnp.zeros((H_PAD, K_PAD), jnp.float32)
               .at[:h2, :net_out].set(w3)
               .at[H_PAD - 1, :net_out].set(b3))
        w1s.append(w1p); w2s.append(w2p); w3s.append(w3p)

    return dict(w1=jnp.stack(w1s).astype(jnp.bfloat16),
                w2=jnp.stack(w2s).astype(jnp.bfloat16),
                w3=jnp.stack(w3s).astype(jnp.bfloat16))


def build_forward(input_size, output_size, out_min, out_max, mixture_count, minimal_std):
    k = int(mixture_count)
    out_min = jnp.asarray(out_min, jnp.float32)
    out_max = jnp.asarray(out_max, jnp.float32)
    mu_coef = 1.1 * 0.5 * (out_max - out_min)
    mu_bias = 1.1 * 0.5 * (out_max + out_min)
    # flat 1-D scalar table (avoids 2-D SMEM [8,128] padding blow-up):
    # per head: [mu_coef, mu_bias, out_min, out_max]
    head_params = jnp.stack([mu_coef, mu_bias, out_min, out_max], axis=-1).reshape(-1)

    def forward(params, state, key):
        b = state.shape[0]
        bpad = max(8, -(-b // 8) * 8)
        state_pad = (jnp.zeros((bpad, IN_PAD), jnp.float32)
                     .at[:b, :input_size].set(state)
                     .at[:, IN_PAD - 1].set(1.0))      # constant-1 lane feeding folded biases

        # All randomness is chain-independent -> precompute outside the kernel
        # (also keeps the kernel free of TPU-only PRNG primitives).
        kg, kn = jax.random.split(key)
        gumbel = jax.random.gumbel(kg, (output_size, bpad, K_PAD), jnp.float32)
        eps = jax.random.normal(kn, (output_size, bpad, 1), jnp.float32)

        kernel = functools.partial(_fused_ar_kernel, bpad=bpad, input_size=input_size,
                                   output_size=output_size, k=k,
                                   minimal_std=float(minimal_std))

        out = pl.pallas_call(
            kernel,
            out_shape=jax.ShapeDtypeStruct((bpad, IN_PAD), jnp.float32),
            in_specs=[
                pl.BlockSpec(memory_space=pltpu.MemorySpace.SMEM),   # head_params (1-D scalars)
                pl.BlockSpec(memory_space=pltpu.MemorySpace.VMEM),   # initial state
                pl.BlockSpec(memory_space=pltpu.MemorySpace.VMEM),   # gumbel noise
                pl.BlockSpec(memory_space=pltpu.MemorySpace.VMEM),   # normal eps
                pl.BlockSpec(memory_space=pltpu.MemorySpace.VMEM),   # w1 stack (bf16)
                pl.BlockSpec(memory_space=pltpu.MemorySpace.VMEM),   # w2 stack (bf16)
                pl.BlockSpec(memory_space=pltpu.MemorySpace.VMEM),   # w3 stack (bf16)
            ],
            out_specs=pl.BlockSpec(memory_space=pltpu.MemorySpace.VMEM),
        )(head_params, state_pad, gumbel, eps,
          params["w1"], params["w2"], params["w3"])

        # samples were appended in-place at columns [input_size, input_size+output_size)
        return out[:b, input_size:input_size + output_size]

    return forward


if __name__ == "__main__":
    # Small configuration consistent with the module's constructor.
    input_size = 16
    output_size = 3
    hidden_layers = [32, 32]
    mixture_count = 5
    minimal_std = 0.01
    batch = 8
    out_min = np.array([-1.0, -2.0, -0.5], dtype=np.float32)
    out_max = np.array([1.0, 2.0, 0.5], dtype=np.float32)

    key = jax.random.PRNGKey(0)
    key, pkey, xkey, skey = jax.random.split(key, 4)

    params = init_params(pkey, input_size, output_size, hidden_layers, mixture_count)
    state = jax.random.normal(xkey, (batch, input_size), jnp.float32)

    forward = build_forward(input_size, output_size, out_min, out_max,
                            mixture_count, minimal_std)
    forward_jit = jax.jit(forward)

    out = jax.block_until_ready(forward_jit(params, state, skey))

    assert out.shape == (batch, output_size), out.shape
    assert bool(jnp.all(jnp.isfinite(out)))
    # every sampled component respects its per-dimension clipping range
    assert bool(jnp.all(out >= jnp.asarray(out_min)[None, :] - 1e-6))
    assert bool(jnp.all(out <= jnp.asarray(out_max)[None, :] + 1e-6))
    # deterministic for a fixed key (all randomness drawn from the JAX key)
    out2 = jax.block_until_ready(forward_jit(params, state, skey))
    assert bool(jnp.all(out == out2))
    print("KERNEL_OK")
</pallas_src>

<mosaic_0001>
module attributes {stable_mosaic.version = 11 : i64} {
  func.func @_fused_ar_kernel(%arg0: memref<12xf32, #tpu.memory_space<smem>>, %arg1: memref<8x128xf32, #tpu.memory_space<vmem>>, %arg2: memref<3x8x128xf32, #tpu.memory_space<vmem>>, %arg3: memref<3x8x1xf32, #tpu.memory_space<vmem>>, %arg4: memref<3x128x128xbf16, #tpu.memory_space<vmem>>, %arg5: memref<3x128x128xbf16, #tpu.memory_space<vmem>>, %arg6: memref<3x128x128xbf16, #tpu.memory_space<vmem>>, %arg7: memref<8x128xf32, #tpu.memory_space<vmem>>) attributes {dimension_semantics = [], scalar_prefetch = 0 : i64, scratch_operands = 0 : i64, tpu.core_type = #tpu.core_type<tc>} {
    %c0 = arith.constant 0 : index
    %c0_0 = arith.constant 0 : index
    %0 = vector.load %arg1[%c0, %c0_0] : memref<8x128xf32, #tpu.memory_space<vmem>>, vector<8x128xf32>
    %c0_1 = arith.constant 0 : index
    %c0_2 = arith.constant 0 : index
    %1 = vector.load %arg7[%c0_1, %c0_2] : memref<8x128xf32, #tpu.memory_space<vmem>>, vector<8x128xf32>
    tpu.vector_store %arg7[%c0_1, %c0_2], %0 {strides = array<i32>} : memref<8x128xf32, #tpu.memory_space<vmem>>, vector<8x128xf32>,
    %2 = tpu.iota {dimensions = array<i32: 1>} : vector<8x128xi32>
    %3 = tpu.iota {dimensions = array<i32: 1>} : vector<8x128xi32>
    %c0_3 = arith.constant 0 : index
    %4 = memref.load %arg0[%c0_3] : memref<12xf32, #tpu.memory_space<smem>>
    %c1 = arith.constant 1 : index
    %5 = memref.load %arg0[%c1] : memref<12xf32, #tpu.memory_space<smem>>
    %c2 = arith.constant 2 : index
    %6 = memref.load %arg0[%c2] : memref<12xf32, #tpu.memory_space<smem>>
    %c3 = arith.constant 3 : index
    %7 = memref.load %arg0[%c3] : memref<12xf32, #tpu.memory_space<smem>>
    %c0_4 = arith.constant 0 : index
    %c0_5 = arith.constant 0 : index
    %8 = vector.load %arg7[%c0_4, %c0_5] : memref<8x128xf32, #tpu.memory_space<vmem>>, vector<8x128xf32>
    %9 = arith.truncf %8 : vector<8x128xf32> to vector<8x128xbf16>
    %c0_6 = arith.constant 0 : index
    %c0_7 = arith.constant 0 : index
    %c0_8 = arith.constant 0 : index
    %10 = vector.load %arg4[%c0_6, %c0_7, %c0_8] : memref<3x128x128xbf16, #tpu.memory_space<vmem>>, vector<1x128x128xbf16>
    %11 = vector.shape_cast %10 : vector<1x128x128xbf16> to vector<128x128xbf16>
    %cst = arith.constant dense<0.000000e+00> : vector<8x128xf32>
    %12 = tpu.matmul %9, %11, %cst {dimension_numbers = #tpu.dot_dimension_numbers<[1], [0], [0], [1], [0, 0, 1, 1], [], []>} : vector<8x128xbf16>, vector<128x128xbf16>, vector<8x128xf32> -> vector<8x128xf32>
    %cst_9 = arith.constant 0.00999999977 : f32
    %13 = vector.broadcast %cst_9 : f32 to vector<8x128xf32>
    %14 = arith.mulf %13, %12 : vector<8x128xf32>
    %15 = arith.maximumf %12, %14 : vector<8x128xf32>
    %16 = arith.truncf %15 : vector<8x128xf32> to vector<8x128xbf16>
    %c0_10 = arith.constant 0 : index
    %c0_11 = arith.constant 0 : index
    %c0_12 = arith.constant 0 : index
    %17 = vector.load %arg5[%c0_10, %c0_11, %c0_12] : memref<3x128x128xbf16, #tpu.memory_space<vmem>>, vector<1x128x128xbf16>
    %18 = vector.shape_cast %17 : vector<1x128x128xbf16> to vector<128x128xbf16>
    %cst_13 = arith.constant dense<0.000000e+00> : vector<8x128xf32>
    %19 = tpu.matmul %16, %18, %cst_13 {dimension_numbers = #tpu.dot_dimension_numbers<[1], [0], [0], [1], [0, 0, 1, 1], [], []>} : vector<8x128xbf16>, vector<128x128xbf16>, vector<8x128xf32> -> vector<8x128xf32>
    %cst_14 = arith.constant 0.00999999977 : f32
    %20 = vector.broadcast %cst_14 : f32 to vector<8x128xf32>
    %21 = arith.mulf %20, %19 : vector<8x128xf32>
    %22 = arith.maximumf %19, %21 : vector<8x128xf32>
    %23 = arith.truncf %22 : vector<8x128xf32> to vector<8x128xbf16>
    %c0_15 = arith.constant 0 : index
    %c0_16 = arith.constant 0 : index
    %c0_17 = arith.constant 0 : index
    %24 = vector.load %arg6[%c0_15, %c0_16, %c0_17] : memref<3x128x128xbf16, #tpu.memory_space<vmem>>, vector<1x128x128xbf16>
    %25 = vector.shape_cast %24 : vector<1x128x128xbf16> to vector<128x128xbf16>
    %cst_18 = arith.constant dense<0.000000e+00> : vector<8x128xf32>
    %26 = tpu.matmul %23, %25, %cst_18 {dimension_numbers = #tpu.dot_dimension_numbers<[1], [0], [0], [1], [0, 0, 1, 1], [], []>} : vector<8x128xbf16>, vector<128x128xbf16>, vector<8x128xf32> -> vector<8x128xf32>
    %c5_i32 = arith.constant 5 : i32
    %27 = vector.broadcast %c5_i32 : i32 to vector<8x128xi32>
    %28 = arith.cmpi slt, %2, %27 : vector<8x128xi32>
    %c0_19 = arith.constant 0 : index
    %c0_20 = arith.constant 0 : index
    %c0_21 = arith.constant 0 : index
    %29 = vector.load %arg2[%c0_19, %c0_20, %c0_21] : memref<3x8x128xf32, #tpu.memory_space<vmem>>, vector<1x8x128xf32>
    %30 = vector.shape_cast %29 : vector<1x8x128xf32> to vector<8x128xf32>
    %31 = arith.addf %26, %30 : vector<8x128xf32>
    %cst_22 = arith.constant -1.000000e+30 : f32
    %32 = vector.broadcast %cst_22 : f32 to vector<8x128xf32>
    %33 = arith.select %28, %31, %32 : vector<8x128xi1>, vector<8x128xf32>
    %cst_23 = arith.constant dense<0xFF800000> : vector<8xf32>
    %34 = vector.multi_reduction <maximumf>, %33, %cst_23 [1] : vector<8x128xf32> to vector<8xf32>
    %35 = vector.shape_cast %34 : vector<8xf32> to vector<8x1xf32>
    %36 = vector.broadcast %35 : vector<8x1xf32> to vector<8x128xf32>
    %37 = arith.cmpf oge, %33, %36 : vector<8x128xf32>
    %c128_i32 = arith.constant 128 : i32
    %38 = vector.broadcast %c128_i32 : i32 to vector<8x128xi32>
    %39 = arith.select %37, %2, %38 : vector<8x128xi1>, vector<8x128xi32>
    %cst_24 = arith.constant dense<2147483647> : vector<8xi32>
    %40 = vector.multi_reduction <minsi>, %39, %cst_24 [1] : vector<8x128xi32> to vector<8xi32>
    %41 = vector.shape_cast %40 : vector<8xi32> to vector<8x1xi32>
    %c0_25 = arith.constant 0 : index
    %c0_26 = arith.constant 0 : index
    %c0_27 = arith.constant 0 : index
    %42 = vector.load %arg3[%c0_25, %c0_26, %c0_27] : memref<3x8x1xf32, #tpu.memory_space<vmem>>, vector<1x8x1xf32>
    %43 = vector.shape_cast %42 : vector<1x8x1xf32> to vector<8x1xf32>
    %c5_i32_28 = arith.constant 5 : i32
    %44 = vector.broadcast %c5_i32_28 : i32 to vector<8x1xi32>
    %45 = arith.addi %41, %44 : vector<8x1xi32>
    %46 = vector.broadcast %45 : vector<8x1xi32> to vector<8x128xi32>
    %47 = arith.cmpi eq, %2, %46 : vector<8x128xi32>
    %c10_i32 = arith.constant 10 : i32
    %48 = vector.broadcast %c10_i32 : i32 to vector<8x1xi32>
    %49 = arith.addi %41, %48 : vector<8x1xi32>
    %50 = vector.broadcast %49 : vector<8x1xi32> to vector<8x128xi32>
    %51 = arith.cmpi eq, %2, %50 : vector<8x128xi32>
    %52 = math.tanh %26 : vector<8x128xf32>
    %53 = vector.broadcast %4 : f32 to vector<8x128xf32>
    %54 = arith.mulf %52, %53 : vector<8x128xf32>
    %55 = vector.broadcast %5 : f32 to vector<8x128xf32>
    %56 = arith.addf %54, %55 : vector<8x128xf32>
    %cst_29 = arith.constant 0.000000e+00 : f32
    %57 = vector.broadcast %cst_29 : f32 to vector<8x128xf32>
    %58 = arith.select %47, %56, %57 : vector<8x128xi1>, vector<8x128xf32>
    %cst_30 = arith.constant -1.000000e+30 : f32
    %59 = vector.broadcast %cst_30 : f32 to vector<8x128xf32>
    %60 = arith.select %51, %26, %59 : vector<8x128xi1>, vector<8x128xf32>
    %61 = math.exp %60 : vector<8x128xf32>
    %62 = vector.broadcast %43 : vector<8x1xf32> to vector<8x128xf32>
    %63 = arith.mulf %62, %61 : vector<8x128xf32>
    %64 = arith.addf %58, %63 : vector<8x128xf32>
    %cst_31 = arith.constant dense<0.000000e+00> : vector<8xf32>
    %65 = vector.multi_reduction <add>, %64, %cst_31 [1] : vector<8x128xf32> to vector<8xf32>
    %66 = vector.shape_cast %65 : vector<8xf32> to vector<8x1xf32>
    %cst_32 = arith.constant 1.001000e-02 : f32
    %67 = vector.broadcast %cst_32 : f32 to vector<8x1xf32>
    %68 = arith.mulf %67, %43 : vector<8x1xf32>
    %69 = arith.addf %66, %68 : vector<8x1xf32>
    %70 = vector.broadcast %6 : f32 to vector<8x1xf32>
    %71 = arith.maximumf %70, %69 : vector<8x1xf32>
    %72 = vector.broadcast %7 : f32 to vector<8x1xf32>
    %73 = arith.minimumf %72, %71 : vector<8x1xf32>
    %c16_i32 = arith.constant 16 : i32
    %74 = vector.broadcast %c16_i32 : i32 to vector<8x128xi32>
    %75 = arith.cmpi eq, %3, %74 : vector<8x128xi32>
    %c0_33 = arith.constant 0 : index
    %c0_34 = arith.constant 0 : index
    %76 = vector.load %arg7[%c0_33, %c0_34] : memref<8x128xf32, #tpu.memory_space<vmem>>, vector<8x128xf32>
    %77 = vector.shape_cast %73 : vector<8x1xf32> to vector<8x1xf32>
    %78 = vector.broadcast %77 : vector<8x1xf32> to vector<8x128xf32>
    %79 = arith.select %75, %78, %76 : vector<8x128xi1>, vector<8x128xf32>
    %c0_35 = arith.constant 0 : index
    %c0_36 = arith.constant 0 : index
    %80 = vector.load %arg7[%c0_35, %c0_36] : memref<8x128xf32, #tpu.memory_space<vmem>>, vector<8x128xf32>
    tpu.vector_store %arg7[%c0_35, %c0_36], %79 {strides = array<i32>} : memref<8x128xf32, #tpu.memory_space<vmem>>, vector<8x128xf32>,
    %c4 = arith.constant 4 : index
    %81 = memref.load %arg0[%c4] : memref<12xf32, #tpu.memory_space<smem>>
    %c5 = arith.constant 5 : index
    %82 = memref.load %arg0[%c5] : memref<12xf32, #tpu.memory_space<smem>>
    %c6 = arith.constant 6 : index
    %83 = memref.load %arg0[%c6] : memref<12xf32, #tpu.memory_space<smem>>
    %c7 = arith.constant 7 : index
    %84 = memref.load %arg0[%c7] : memref<12xf32, #tpu.memory_space<smem>>
    %c0_37 = arith.constant 0 : index
    %c0_38 = arith.constant 0 : index
    %85 = vector.load %arg7[%c0_37, %c0_38] : memref<8x128xf32, #tpu.memory_space<vmem>>, vector<8x128xf32>
    %86 = arith.truncf %85 : vector<8x128xf32> to vector<8x128xbf16>
    %c1_39 = arith.constant 1 : index
    %c0_40 = arith.constant 0 : index
    %c0_41 = arith.constant 0 : index
    %87 = vector.load %arg4[%c1_39, %c0_40, %c0_41] : memref<3x128x128xbf16, #tpu.memory_space<vmem>>, vector<1x128x128xbf16>
    %88 = vector.shape_cast %87 : vector<1x128x128xbf16> to vector<128x128xbf16>
    %cst_42 = arith.constant dense<0.000000e+00> : vector<8x128xf32>
    %89 = tpu.matmul %86, %88, %cst_42 {dimension_numbers = #tpu.dot_dimension_numbers<[1], [0], [0], [1], [0, 0, 1, 1], [], []>} : vector<8x128xbf16>, vector<128x128xbf16>, vector<8x128xf32> -> vector<8x128xf32>
    %cst_43 = arith.constant 0.00999999977 : f32
    %90 = vector.broadcast %cst_43 : f32 to vector<8x128xf32>
    %91 = arith.mulf %90, %89 : vector<8x128xf32>
    %92 = arith.maximumf %89, %91 : vector<8x128xf32>
    %93 = arith.truncf %92 : vector<8x128xf32> to vector<8x128xbf16>
    %c1_44 = arith.constant 1 : index
    %c0_45 = arith.constant 0 : index
    %c0_46 = arith.constant 0 : index
    %94 = vector.load %arg5[%c1_44, %c0_45, %c0_46] : memref<3x128x128xbf16, #tpu.memory_space<vmem>>, vector<1x128x128xbf16>
    %95 = vector.shape_cast %94 : vector<1x128x128xbf16> to vector<128x128xbf16>
    %cst_47 = arith.constant dense<0.000000e+00> : vector<8x128xf32>
    %96 = tpu.matmul %93, %95, %cst_47 {dimension_numbers = #tpu.dot_dimension_numbers<[1], [0], [0], [1], [0, 0, 1, 1], [], []>} : vector<8x128xbf16>, vector<128x128xbf16>, vector<8x128xf32> -> vector<8x128xf32>
    %cst_48 = arith.constant 0.00999999977 : f32
    %97 = vector.broadcast %cst_48 : f32 to vector<8x128xf32>
    %98 = arith.mulf %97, %96 : vector<8x128xf32>
    %99 = arith.maximumf %96, %98 : vector<8x128xf32>
    %100 = arith.truncf %99 : vector<8x128xf32> to vector<8x128xbf16>
    %c1_49 = arith.constant 1 : index
    %c0_50 = arith.constant 0 : index
    %c0_51 = arith.constant 0 : index
    %101 = vector.load %arg6[%c1_49, %c0_50, %c0_51] : memref<3x128x128xbf16, #tpu.memory_space<vmem>>, vector<1x128x128xbf16>
    %102 = vector.shape_cast %101 : vector<1x128x128xbf16> to vector<128x128xbf16>
    %cst_52 = arith.constant dense<0.000000e+00> : vector<8x128xf32>
    %103 = tpu.matmul %100, %102, %cst_52 {dimension_numbers = #tpu.dot_dimension_numbers<[1], [0], [0], [1], [0, 0, 1, 1], [], []>} : vector<8x128xbf16>, vector<128x128xbf16>, vector<8x128xf32> -> vector<8x128xf32>
    %c5_i32_53 = arith.constant 5 : i32
    %104 = vector.broadcast %c5_i32_53 : i32 to vector<8x128xi32>
    %105 = arith.cmpi slt, %2, %104 : vector<8x128xi32>
    %c1_54 = arith.constant 1 : index
    %c0_55 = arith.constant 0 : index
    %c0_56 = arith.constant 0 : index
    %106 = vector.load %arg2[%c1_54, %c0_55, %c0_56] : memref<3x8x128xf32, #tpu.memory_space<vmem>>, vector<1x8x128xf32>
    %107 = vector.shape_cast %106 : vector<1x8x128xf32> to vector<8x128xf32>
    %108 = arith.addf %103, %107 : vector<8x128xf32>
    %cst_57 = arith.constant -1.000000e+30 : f32
    %109 = vector.broadcast %cst_57 : f32 to vector<8x128xf32>
    %110 = arith.select %105, %108, %109 : vector<8x128xi1>, vector<8x128xf32>
    %cst_58 = arith.constant dense<0xFF800000> : vector<8xf32>
    %111 = vector.multi_reduction <maximumf>, %110, %cst_58 [1] : vector<8x128xf32> to vector<8xf32>
    %112 = vector.shape_cast %111 : vector<8xf32> to vector<8x1xf32>
    %113 = vector.broadcast %112 : vector<8x1xf32> to vector<8x128xf32>
    %114 = arith.cmpf oge, %110, %113 : vector<8x128xf32>
    %c128_i32_59 = arith.constant 128 : i32
    %115 = vector.broadcast %c128_i32_59 : i32 to vector<8x128xi32>
    %116 = arith.select %114, %2, %115 : vector<8x128xi1>, vector<8x128xi32>
    %cst_60 = arith.constant dense<2147483647> : vector<8xi32>
    %117 = vector.multi_reduction <minsi>, %116, %cst_60 [1] : vector<8x128xi32> to vector<8xi32>
    %118 = vector.shape_cast %117 : vector<8xi32> to vector<8x1xi32>
    %c1_61 = arith.constant 1 : index
    %c0_62 = arith.constant 0 : index
    %c0_63 = arith.constant 0 : index
    %119 = vector.load %arg3[%c1_61, %c0_62, %c0_63] : memref<3x8x1xf32, #tpu.memory_space<vmem>>, vector<1x8x1xf32>
    %120 = vector.shape_cast %119 : vector<1x8x1xf32> to vector<8x1xf32>
    %c5_i32_64 = arith.constant 5 : i32
    %121 = vector.broadcast %c5_i32_64 : i32 to vector<8x1xi32>
    %122 = arith.addi %118, %121 : vector<8x1xi32>
    %123 = vector.broadcast %122 : vector<8x1xi32> to vector<8x128xi32>
    %124 = arith.cmpi eq, %2, %123 : vector<8x128xi32>
    %c10_i32_65 = arith.constant 10 : i32
    %125 = vector.broadcast %c10_i32_65 : i32 to vector<8x1xi32>
    %126 = arith.addi %118, %125 : vector<8x1xi32>
    %127 = vector.broadcast %126 : vector<8x1xi32> to vector<8x128xi32>
    %128 = arith.cmpi eq, %2, %127 : vector<8x128xi32>
    %129 = math.tanh %103 : vector<8x128xf32>
    %130 = vector.broadcast %81 : f32 to vector<8x128xf32>
    %131 = arith.mulf %129, %130 : vector<8x128xf32>
    %132 = vector.broadcast %82 : f32 to vector<8x128xf32>
    %133 = arith.addf %131, %132 : vector<8x128xf32>
    %cst_66 = arith.constant 0.000000e+00 : f32
    %134 = vector.broadcast %cst_66 : f32 to vector<8x128xf32>
    %135 = arith.select %124, %133, %134 : vector<8x128xi1>, vector<8x128xf32>
    %cst_67 = arith.constant -1.000000e+30 : f32
    %136 = vector.broadcast %cst_67 : f32 to vector<8x128xf32>
    %137 = arith.select %128, %103, %136 : vector<8x128xi1>, vector<8x128xf32>
    %138 = math.exp %137 : vector<8x128xf32>
    %139 = vector.broadcast %120 : vector<8x1xf32> to vector<8x128xf32>
    %140 = arith.mulf %139, %138 : vector<8x128xf32>
    %141 = arith.addf %135, %140 : vector<8x128xf32>
    %cst_68 = arith.constant dense<0.000000e+00> : vector<8xf32>
    %142 = vector.multi_reduction <add>, %141, %cst_68 [1] : vector<8x128xf32> to vector<8xf32>
    %143 = vector.shape_cast %142 : vector<8xf32> to vector<8x1xf32>
    %cst_69 = arith.constant 1.001000e-02 : f32
    %144 = vector.broadcast %cst_69 : f32 to vector<8x1xf32>
    %145 = arith.mulf %144, %120 : vector<8x1xf32>
    %146 = arith.addf %143, %145 : vector<8x1xf32>
    %147 = vector.broadcast %83 : f32 to vector<8x1xf32>
    %148 = arith.maximumf %147, %146 : vector<8x1xf32>
    %149 = vector.broadcast %84 : f32 to vector<8x1xf32>
    %150 = arith.minimumf %149, %148 : vector<8x1xf32>
    %c17_i32 = arith.constant 17 : i32
    %151 = vector.broadcast %c17_i32 : i32 to vector<8x128xi32>
    %152 = arith.cmpi eq, %3, %151 : vector<8x128xi32>
    %c0_70 = arith.constant 0 : index
    %c0_71 = arith.constant 0 : index
    %153 = vector.load %arg7[%c0_70, %c0_71] : memref<8x128xf32, #tpu.memory_space<vmem>>, vector<8x128xf32>
    %154 = vector.shape_cast %150 : vector<8x1xf32> to vector<8x1xf32>
    %155 = vector.broadcast %154 : vector<8x1xf32> to vector<8x128xf32>
    %156 = arith.select %152, %155, %153 : vector<8x128xi1>, vector<8x128xf32>
    %c0_72 = arith.constant 0 : index
    %c0_73 = arith.constant 0 : index
    %157 = vector.load %arg7[%c0_72, %c0_73] : memref<8x128xf32, #tpu.memory_space<vmem>>, vector<8x128xf32>
    tpu.vector_store %arg7[%c0_72, %c0_73], %156 {strides = array<i32>} : memref<8x128xf32, #tpu.memory_space<vmem>>, vector<8x128xf32>,
    %c8 = arith.constant 8 : index
    %158 = memref.load %arg0[%c8] : memref<12xf32, #tpu.memory_space<smem>>
    %c9 = arith.constant 9 : index
    %159 = memref.load %arg0[%c9] : memref<12xf32, #tpu.memory_space<smem>>
    %c10 = arith.constant 10 : index
    %160 = memref.load %arg0[%c10] : memref<12xf32, #tpu.memory_space<smem>>
    %c11 = arith.constant 11 : index
    %161 = memref.load %arg0[%c11] : memref<12xf32, #tpu.memory_space<smem>>
    %c0_74 = arith.constant 0 : index
    %c0_75 = arith.constant 0 : index
    %162 = vector.load %arg7[%c0_74, %c0_75] : memref<8x128xf32, #tpu.memory_space<vmem>>, vector<8x128xf32>
    %163 = arith.truncf %162 : vector<8x128xf32> to vector<8x128xbf16>
    %c2_76 = arith.constant 2 : index
    %c0_77 = arith.constant 0 : index
    %c0_78 = arith.constant 0 : index
    %164 = vector.load %arg4[%c2_76, %c0_77, %c0_78] : memref<3x128x128xbf16, #tpu.memory_space<vmem>>, vector<1x128x128xbf16>
    %165 = vector.shape_cast %164 : vector<1x128x128xbf16> to vector<128x128xbf16>
    %cst_79 = arith.constant dense<0.000000e+00> : vector<8x128xf32>
    %166 = tpu.matmul %163, %165, %cst_79 {dimension_numbers = #tpu.dot_dimension_numbers<[1], [0], [0], [1], [0, 0, 1, 1], [], []>} : vector<8x128xbf16>, vector<128x128xbf16>, vector<8x128xf32> -> vector<8x128xf32>
    %cst_80 = arith.constant 0.00999999977 : f32
    %167 = vector.broadcast %cst_80 : f32 to vector<8x128xf32>
    %168 = arith.mulf %167, %166 : vector<8x128xf32>
    %169 = arith.maximumf %166, %168 : vector<8x128xf32>
    %170 = arith.truncf %169 : vector<8x128xf32> to vector<8x128xbf16>
    %c2_81 = arith.constant 2 : index
    %c0_82 = arith.constant 0 : index
    %c0_83 = arith.constant 0 : index
    %171 = vector.load %arg5[%c2_81, %c0_82, %c0_83] : memref<3x128x128xbf16, #tpu.memory_space<vmem>>, vector<1x128x128xbf16>
    %172 = vector.shape_cast %171 : vector<1x128x128xbf16> to vector<128x128xbf16>
    %cst_84 = arith.constant dense<0.000000e+00> : vector<8x128xf32>
    %173 = tpu.matmul %170, %172, %cst_84 {dimension_numbers = #tpu.dot_dimension_numbers<[1], [0], [0], [1], [0, 0, 1, 1], [], []>} : vector<8x128xbf16>, vector<128x128xbf16>, vector<8x128xf32> -> vector<8x128xf32>
    %cst_85 = arith.constant 0.00999999977 : f32
    %174 = vector.broadcast %cst_85 : f32 to vector<8x128xf32>
    %175 = arith.mulf %174, %173 : vector<8x128xf32>
    %176 = arith.maximumf %173, %175 : vector<8x128xf32>
    %177 = arith.truncf %176 : vector<8x128xf32> to vector<8x128xbf16>
    %c2_86 = arith.constant 2 : index
    %c0_87 = arith.constant 0 : index
    %c0_88 = arith.constant 0 : index
    %178 = vector.load %arg6[%c2_86, %c0_87, %c0_88] : memref<3x128x128xbf16, #tpu.memory_space<vmem>>, vector<1x128x128xbf16>
    %179 = vector.shape_cast %178 : vector<1x128x128xbf16> to vector<128x128xbf16>
    %cst_89 = arith.constant dense<0.000000e+00> : vector<8x128xf32>
    %180 = tpu.matmul %177, %179, %cst_89 {dimension_numbers = #tpu.dot_dimension_numbers<[1], [0], [0], [1], [0, 0, 1, 1], [], []>} : vector<8x128xbf16>, vector<128x128xbf16>, vector<8x128xf32> -> vector<8x128xf32>
    %c5_i32_90 = arith.constant 5 : i32
    %181 = vector.broadcast %c5_i32_90 : i32 to vector<8x128xi32>
    %182 = arith.cmpi slt, %2, %181 : vector<8x128xi32>
    %c2_91 = arith.constant 2 : index
    %c0_92 = arith.constant 0 : index
    %c0_93 = arith.constant 0 : index
    %183 = vector.load %arg2[%c2_91, %c0_92, %c0_93] : memref<3x8x128xf32, #tpu.memory_space<vmem>>, vector<1x8x128xf32>
    %184 = vector.shape_cast %183 : vector<1x8x128xf32> to vector<8x128xf32>
    %185 = arith.addf %180, %184 : vector<8x128xf32>
    %cst_94 = arith.constant -1.000000e+30 : f32
    %186 = vector.broadcast %cst_94 : f32 to vector<8x128xf32>
    %187 = arith.select %182, %185, %186 : vector<8x128xi1>, vector<8x128xf32>
    %cst_95 = arith.constant dense<0xFF800000> : vector<8xf32>
    %188 = vector.multi_reduction <maximumf>, %187, %cst_95 [1] : vector<8x128xf32> to vector<8xf32>
    %189 = vector.shape_cast %188 : vector<8xf32> to vector<8x1xf32>
    %190 = vector.broadcast %189 : vector<8x1xf32> to vector<8x128xf32>
    %191 = arith.cmpf oge, %187, %190 : vector<8x128xf32>
    %c128_i32_96 = arith.constant 128 : i32
    %192 = vector.broadcast %c128_i32_96 : i32 to vector<8x128xi32>
    %193 = arith.select %191, %2, %192 : vector<8x128xi1>, vector<8x128xi32>
    %cst_97 = arith.constant dense<2147483647> : vector<8xi32>
    %194 = vector.multi_reduction <minsi>, %193, %cst_97 [1] : vector<8x128xi32> to vector<8xi32>
    %195 = vector.shape_cast %194 : vector<8xi32> to vector<8x1xi32>
    %c2_98 = arith.constant 2 : index
    %c0_99 = arith.constant 0 : index
    %c0_100 = arith.constant 0 : index
    %196 = vector.load %arg3[%c2_98, %c0_99, %c0_100] : memref<3x8x1xf32, #tpu.memory_space<vmem>>, vector<1x8x1xf32>
    %197 = vector.shape_cast %196 : vector<1x8x1xf32> to vector<8x1xf32>
    %c5_i32_101 = arith.constant 5 : i32
    %198 = vector.broadcast %c5_i32_101 : i32 to vector<8x1xi32>
    %199 = arith.addi %195, %198 : vector<8x1xi32>
    %200 = vector.broadcast %199 : vector<8x1xi32> to vector<8x128xi32>
    %201 = arith.cmpi eq, %2, %200 : vector<8x128xi32>
    %c10_i32_102 = arith.constant 10 : i32
    %202 = vector.broadcast %c10_i32_102 : i32 to vector<8x1xi32>
    %203 = arith.addi %195, %202 : vector<8x1xi32>
    %204 = vector.broadcast %203 : vector<8x1xi32> to vector<8x128xi32>
    %205 = arith.cmpi eq, %2, %204 : vector<8x128xi32>
    %206 = math.tanh %180 : vector<8x128xf32>
    %207 = vector.broadcast %158 : f32 to vector<8x128xf32>
    %208 = arith.mulf %206, %207 : vector<8x128xf32>
    %209 = vector.broadcast %159 : f32 to vector<8x128xf32>
    %210 = arith.addf %208, %209 : vector<8x128xf32>
    %cst_103 = arith.constant 0.000000e+00 : f32
    %211 = vector.broadcast %cst_103 : f32 to vector<8x128xf32>
    %212 = arith.select %201, %210, %211 : vector<8x128xi1>, vector<8x128xf32>
    %cst_104 = arith.constant -1.000000e+30 : f32
    %213 = vector.broadcast %cst_104 : f32 to vector<8x128xf32>
    %214 = arith.select %205, %180, %213 : vector<8x128xi1>, vector<8x128xf32>
    %215 = math.exp %214 : vector<8x128xf32>
    %216 = vector.broadcast %197 : vector<8x1xf32> to vector<8x128xf32>
    %217 = arith.mulf %216, %215 : vector<8x128xf32>
    %218 = arith.addf %212, %217 : vector<8x128xf32>
    %cst_105 = arith.constant dense<0.000000e+00> : vector<8xf32>
    %219 = vector.multi_reduction <add>, %218, %cst_105 [1] : vector<8x128xf32> to vector<8xf32>
    %220 = vector.shape_cast %219 : vector<8xf32> to vector<8x1xf32>
    %cst_106 = arith.constant 1.001000e-02 : f32
    %221 = vector.broadcast %cst_106 : f32 to vector<8x1xf32>
    %222 = arith.mulf %221, %197 : vector<8x1xf32>
    %223 = arith.addf %220, %222 : vector<8x1xf32>
    %224 = vector.broadcast %160 : f32 to vector<8x1xf32>
    %225 = arith.maximumf %224, %223 : vector<8x1xf32>
    %226 = vector.broadcast %161 : f32 to vector<8x1xf32>
    %227 = arith.minimumf %226, %225 : vector<8x1xf32>
    %c18_i32 = arith.constant 18 : i32
    %228 = vector.broadcast %c18_i32 : i32 to vector<8x128xi32>
    %229 = arith.cmpi eq, %3, %228 : vector<8x128xi32>
    %c0_107 = arith.constant 0 : index
    %c0_108 = arith.constant 0 : index
    %230 = vector.load %arg7[%c0_107, %c0_108] : memref<8x128xf32, #tpu.memory_space<vmem>>, vector<8x128xf32>
    %231 = vector.shape_cast %227 : vector<8x1xf32> to vector<8x1xf32>
    %232 = vector.broadcast %231 : vector<8x1xf32> to vector<8x128xf32>
    %233 = arith.select %229, %232, %230 : vector<8x128xi1>, vector<8x128xf32>
    %c0_109 = arith.constant 0 : index
    %c0_110 = arith.constant 0 : index
    %234 = vector.load %arg7[%c0_109, %c0_110] : memref<8x128xf32, #tpu.memory_space<vmem>>, vector<8x128xf32>
    tpu.vector_store %arg7[%c0_109, %c0_110], %233 {strides = array<i32>} : memref<8x128xf32, #tpu.memory_space<vmem>>, vector<8x128xf32>,
    return
  }
}

</mosaic_0001>

<bundles_post_ra>
// kernel: forward.1
= control target key start
LH: loop header
LB: loop body
LE: loop exit
PB: predicated region body
PF: predicated region fallthrough
CT: control target
= control target key end

     0   :  { %12 = vsyncpa [#allocation4], 0  ;;  %s1621_s0 = inlined_call_operand.vmem [shape: f32[12], index: 0, kind: input, shape index: {}]   ;;  %s1622_s1 = inlined_call_operand.vmem [shape: f32[8,128], index: 1, kind: input, shape index: {}]   ;;  %s1623_s2 = inlined_call_operand.vmem [shape: f32[3,8,128], index: 2, kind: input, shape index: {}]   ;;  %s1624_s3 = inlined_call_operand.vmem [shape: f32[3,8,1], index: 3, kind: input, shape index: {}]   ;;  %s1625_s4 = inlined_call_operand.hbm [shape: bf16[3,128,128], index: 4, kind: input, shape index: {}]   ;;  %s1626_s5 = inlined_call_operand.hbm [shape: bf16[3,128,128], index: 5, kind: input, shape index: {}]   ;;  %s1627_s6 = inlined_call_operand.hbm [shape: bf16[3,128,128], index: 6, kind: input, shape index: {}]   ;;  %s1628_s7 = inlined_call_operand.vmem [shape: f32[8,128], index: 7, kind: output, shape index: {}]  }
   0x1   :  { %13 = vsyncpa [#allocation3], 0 }
   0x2   :  { %14 = vsyncpa [#allocation7], 0  ;;  %s47_s26 = sshll.u32 %s1626_s5, 4  ;;  %s1498_s27 = smov [#allocation6]   ;;  %s48_s26 = int_to_ptr.hbm [resolvable:$true] %s47_s26 }
   0x3   :  { %s49_s28 = sshll.u32 %s1498_s27, 4  ;;  %s20_s8 = sshll.u32 %s1621_s0, 4  ;;  %s50_s28 = int_to_ptr.vmem [resolvable:$true] %s49_s28  ;;  %s21_s8 = int_to_ptr.vmem [resolvable:$true] %s20_s8 }
   0x4   :  { %s1499_s9 = smov 64   ;;  %s1500_s10 = smov 4  }
   0x5   :  { %55 = dma.hbm_to_vmem [thread:$0]  %s48_s26, 3072, %s50_s28, [#allocation7], %s1499_s9, %s1499_s9, %s1500_s10  }
   0x6   :  { %s1501_s11 = smov [#allocation2]   ;;  %s34_s14 = sshll.u32 %s1625_s4, 4  ;;  %s35_s14 = int_to_ptr.hbm [resolvable:$true] %s34_s14 }
   0x7   :  { %23 = dma.vmem_to_smem %s21_s8, 16, %s1501_s11, [#allocation4]  }
   0x8   :  { %s1502_s5 = smov [#allocation5]   ;;  %s60_s18 = sshll.u32 %s1627_s6, 4  ;;  %s61_s18 = int_to_ptr.hbm [resolvable:$true] %s60_s18 }
   0x9   :  { %s36_s15 = sshll.u32 %s1502_s5, 4  ;;  %s1503_s0 = smov [#allocation8]   ;;  %s37_s15 = int_to_ptr.vmem [resolvable:$true] %s36_s15 }
   0xa   :  { %42 = dma.hbm_to_vmem [thread:$0]  %s35_s14, 3072, %s37_s15, [#allocation3], %s1499_s9, %s1499_s9, %s1500_s10  }
   0xb   :  { %s62_s19 = sshll.u32 %s1503_s0, 4  ;;  %s63_s19 = int_to_ptr.vmem [resolvable:$true] %s62_s19 }
   0xc   :  { %68 = dma.hbm_to_vmem [thread:$0]  %s61_s18, 3072, %s63_s19, [#allocation7], %s1499_s9, %s1499_s9, %s1500_s10  }
   0xd   :  { %1492 = dma.done.wait [#allocation4], 16  }
   0xe   :  { %1493 = vsyncadd [#allocation4], 4294967280 }
   0xf   :  { %1494 = dma.done.wait [#allocation3], 3072  }
  0x10   :  { %1495 = vsyncadd [#allocation3], 4294964224 }
  0x11   :  { %1496 = dma.done.wait [#allocation7], 6144  }
  0x12   :  { %1497 = vsyncadd [#allocation7], 4294961152 }
  0x13   :  { %85 = sfence }
  0x14   :  { %v1321_v0 = vld [vmem:[#allocation5 + $0x38] sm:$0xff]  ;;  %v1320_v1 = vld [vmem:[#allocation5 + $0x30] sm:$0xff]  ;;  %v1319_v4 = vld [vmem:[#allocation5 + $0x28] sm:$0xff]  ;;  %v88_v36 = vlaneseq  ;;  %v1504_v47 = vmov 0   ;;  %s90_s23 = sld [smem:[#allocation2]] }
  0x15   :  { %160 = vmatpush.bf16.msra.mxu0 %v1321_v0  ;;  %v1329_v2 = vld [vmem:[#allocation6 + $0x38] sm:$0xff]  ;;  %v1328_v3 = vld [vmem:[#allocation6 + $0x30] sm:$0xff]  ;;  %v1327_v5 = vld [vmem:[#allocation6 + $0x28] sm:$0xff]  ;;  %1393 = vset.pattern.permute.xlu1 %v1504_v47  ;;  %s1011_s24 = sld [smem:[#allocation2 + $0x1]] }
  0x16   :  { %240 = vmatpush.bf16.msra.mxu1 %v1329_v2  ;;  %v1318_v6 = vld [vmem:[#allocation5 + $0x20] sm:$0xff]  ;;  %v1317_v8 = vld [vmem:[#allocation5 + $0x18] sm:$0xff]  ;;  %v1316_v10 = vld [vmem:[#allocation5 + $0x10] sm:$0xff]  ;;  %v1564_v37 = vand.u32 127, %v88_v36  ;;  %1394 = vset.pattern.permute.xlu2 %v1504_v47  ;;  %s1012_s25 = sld [smem:[#allocation2 + $0x2]] }
  0x17   :  { %v1326_v7 = vld [vmem:[#allocation6 + $0x20] sm:$0xff]  ;;  %v1325_v9 = vld [vmem:[#allocation6 + $0x18] sm:$0xff]  ;;  %v1324_v11 = vld [vmem:[#allocation6 + $0x10] sm:$0xff]  ;;  %1395 = vset.pattern.permute.xlu0 %v1504_v47  ;;  %s1013_s26 = sld [smem:[#allocation2 + $0x3]] }
  0x18   :  { %v1315_v12 = vld [vmem:[#allocation5 + $0x8] sm:$0xff]  ;;  %v1314_v13 = vld [vmem:[#allocation5] sm:$0xff]  ;;  %v1337_v18 = vld [vmem:[#allocation8 + $0x38] sm:$0xff]  ;;  %vm333_vm0 = vcmp.lt.s32.totalorder %v1564_v37, 5  ;;  %vm384_vm5 = vcmp.eq.s32.totalorder %v1564_v37, 16  ;;  %s1110_s8 = sld [smem:[#allocation2 + $0x4]] }
  0x19   :  { %161 = vmatpush.bf16.msra.mxu0 %v1320_v1  ;;  %v1560_v14 = vld [vmem:[%s1622_s1] sm:$0xff]  ;;  %v1323_v16 = vld [vmem:[#allocation6 + $0x8] sm:$0xff]  ;;  %320 = vmatpush.bf16.msra.mxu2 %v1337_v18  ;;  %v1336_v19 = vld [vmem:[#allocation8 + $0x30] sm:$0xff]  ;;  %s1111_s9 = sld [smem:[#allocation2 + $0x5]]  ;;  %vm690_vm10 = vcmp.eq.s32.totalorder %v1564_v37, 17  ;;  %vm996_vm15 = vcmp.eq.s32.totalorder %v1564_v37, 18 }
  0x1a   :  { %241 = vmatpush.bf16.msra.mxu1 %v1328_v3  ;;  %v95_v15 = vpack.c.bf16 %v1560_v14, %v1560_v14  ;;  %v1322_v17 = vld [vmem:[#allocation6] sm:$0xff]  ;;  %v1335_v20 = vld [vmem:[#allocation8 + $0x28] sm:$0xff]  ;;  %v1333_v22 = vld [vmem:[#allocation8 + $0x18] sm:$0xff]  ;;  %v361_v62 = vstv %s90_s23  ;;  %s1112_s10 = sld [smem:[#allocation2 + $0x6]] }
  0x1b   :  { %v1334_v21 = vld [vmem:[#allocation8 + $0x20] sm:$0xff]  ;;  %v1332_v23 = vld [vmem:[#allocation8 + $0x10] sm:$0xff]  ;;  %v1331_v29 = vld [vmem:[#allocation8 + $0x8] sm:$0xff]  ;;  %v363_v1 = vstv %s1011_s24  ;;  %s1113_s11 = sld [smem:[#allocation2 + $0x7]] }
  0x1c   :  { %v1330_v30 = vld [vmem:[#allocation8] sm:$0xff]  ;;  %v1361_v36 = vld [vmem:[#allocation8 + $0x78] sm:$0xff]  ;;  %v1355_v47 = vld [vmem:[#allocation8 + $0x48] sm:$0xff]  ;;  %s1214_s15 = sld [smem:[#allocation2 + $0xa]] }
  0x1d   :  { %162 = vmatpush.bf16.msra.mxu0 %v1319_v4  ;;  %321 = vmatpush.bf16.msra.mxu2 %v1336_v19  ;;  %v334_v38 = vld [vmem:[%s1623_s2] sm:$0xff]  ;;  %v382_v18 = vstv %s1013_s26  ;;  %s1215_s16 = sld [smem:[#allocation2 + $0xb]] }
  0x1e   :  { %242 = vmatpush.bf16.msra.mxu1 %v1327_v5  ;;  %v355_v52 = vld [vmem:[%s1624_s3] sm:$0xff] }
  0x21   :  { %163 = vmatpush.bf16.msra.mxu0 %v1318_v6  ;;  %322 = vmatpush.bf16.msra.mxu2 %v1335_v20 }
  0x22   :  { %243 = vmatpush.bf16.msra.mxu1 %v1326_v7 }
  0x25   :  { %164 = vmatpush.bf16.msra.mxu0 %v1317_v8  ;;  %323 = vmatpush.bf16.msra.mxu2 %v1334_v21  ;;  %v1345_v8 = vld [vmem:[#allocation5 + $0x78] sm:$0xff]  ;;  %v1581_v21 = vld [vmem:[%s1624_s3 + $0x8] sm:$0xff] }
  0x26   :  { %244 = vmatpush.bf16.msra.mxu1 %v1325_v9  ;;  %463 = vmatpush.bf16.msra.mxu3 %v1345_v8  ;;  %v1344_v9 = vld [vmem:[#allocation5 + $0x70] sm:$0xff] }
  0x29   :  { %165 = vmatpush.bf16.msra.mxu0 %v1316_v10  ;;  %324 = vmatpush.bf16.msra.mxu2 %v1333_v22  ;;  %v1343_v10 = vld [vmem:[#allocation5 + $0x68] sm:$0xff]  ;;  %v1340_v22 = vld [vmem:[#allocation5 + $0x50] sm:$0xff] }
  0x2a   :  { %245 = vmatpush.bf16.msra.mxu1 %v1324_v11  ;;  %464 = vmatpush.bf16.msra.mxu3 %v1344_v9  ;;  %v1342_v11 = vld [vmem:[#allocation5 + $0x60] sm:$0xff] }
  0x2d   :  { %166 = vmatpush.bf16.msra.mxu0 %v1315_v12  ;;  %325 = vmatpush.bf16.msra.mxu2 %v1332_v23  ;;  %v378_v12 = vmul.f32 0.01001, %v355_v52  ;;  %v1339_v23 = vld [vmem:[#allocation5 + $0x48] sm:$0xff] }
  0x2e   :  { %246 = vmatpush.bf16.msra.mxu1 %v1323_v16  ;;  %465 = vmatpush.bf16.msra.mxu3 %v1343_v10 }
  0x31   :  { %167 = vmatpush.bf16.msra.mxu0 %v1314_v13  ;;  %326 = vmatpush.bf16.msra.mxu2 %v1331_v29  ;;  %v1341_v13 = vld [vmem:[#allocation5 + $0x58] sm:$0xff] }
  0x32   :  { %247 = vmatpush.bf16.msra.mxu1 %v1322_v17  ;;  %466 = vmatpush.bf16.msra.mxu3 %v1342_v11  ;;  %v1349_v29 = vld [vmem:[#allocation6 + $0x58] sm:$0xff] }
  0x34   :  { %168 = vmatmul.bf16.vlgmr.msra.gmra.mxu0 %v95_v15  ;;  %v380_v15 = vstv %s1012_s25 }
  0x35   :  { %327 = vmatpush.bf16.msra.mxu2 %v1330_v30  ;;  %v1348_v30 = vld [vmem:[#allocation6 + $0x50] sm:$0xff] }
  0x36   :  { %467 = vmatpush.bf16.msra.mxu3 %v1341_v13  ;;  %625 = vmatpush.bf16.msrb.mxu1 %v1361_v36 }
  0x3a   :  { %468 = vmatpush.bf16.msra.mxu3 %v1340_v22 }
  0x3e   :  { %469 = vmatpush.bf16.msra.mxu3 %v1339_v23 }
  0xb1   :  { %v169_v24 = vpop.f32.mrf.mxu0 }
  0xb2   :  { %v173_v25 = vmul.f32 0.01, %v169_v24 }
  0xb4   :  { %v174_v26 = vmax.f32 %v169_v24, %v173_v25  ;;  %v1338_v24 = vld [vmem:[#allocation5 + $0x40] sm:$0xff]  ;;  %v1353_v25 = vld [vmem:[#allocation6 + $0x78] sm:$0xff] }
  0xb5   :  { %470 = vmatpush.bf16.msra.mxu3 %v1338_v24  ;;  %544 = vmatpush.bf16.msrb.mxu0 %v1353_v25  ;;  %v1369_v24 = vld [vmem:[#allocation5 + $0xb8] sm:$0xff]  ;;  %v1368_v25 = vld [vmem:[#allocation5 + $0xb0] sm:$0xff] }
  0xb6   :  { %v175_v27 = vpack.c.bf16 %v174_v26, %v174_v26  ;;  %v1352_v26 = vld [vmem:[#allocation6 + $0x70] sm:$0xff]  ;;  %769 = vmatpush.bf16.msrb.mxu2 %v1369_v24 }
  0xb8   :  { %248 = vmatmul.bf16.vlgmr.msra.gmra.mxu1 %v175_v27  ;;  %v1351_v27 = vld [vmem:[#allocation6 + $0x68] sm:$0xff] }
  0xb9   :  { %v171_v28 = vpop.f32.mrf.mxu0  ;;  %545 = vmatpush.bf16.msrb.mxu0 %v1352_v26  ;;  %v1367_v26 = vld [vmem:[#allocation5 + $0xa8] sm:$0xff] }
  0xba   :  { %v1350_v28 = vld [vmem:[#allocation6 + $0x60] sm:$0xff]  ;;  %770 = vmatpush.bf16.msrb.mxu2 %v1368_v25 }
  0xbd   :  { %546 = vmatpush.bf16.msrb.mxu0 %v1351_v27  ;;  %v1366_v27 = vld [vmem:[#allocation5 + $0xa0] sm:$0xff] }
  0xbe   :  { %771 = vmatpush.bf16.msrb.mxu2 %v1367_v26 }
  0xc1   :  { %547 = vmatpush.bf16.msrb.mxu0 %v1350_v28  ;;  %v1365_v28 = vld [vmem:[#allocation5 + $0x98] sm:$0xff] }
  0xc2   :  { %772 = vmatpush.bf16.msrb.mxu2 %v1366_v27 }
  0xc5   :  { %548 = vmatpush.bf16.msrb.mxu0 %v1349_v29  ;;  %v684_v29 = vmul.f32 0.01001, %v1581_v21 }
  0xc6   :  { %773 = vmatpush.bf16.msrb.mxu2 %v1365_v28 }
  0xc9   :  { %549 = vmatpush.bf16.msrb.mxu0 %v1348_v30  ;;  %v686_v30 = vstv %s1112_s10 }
 0x135   :  { %v249_v31 = vpop.f32.mrf.mxu1 }
 0x136   :  { %v253_v32 = vmul.f32 0.01, %v249_v31 }
 0x138   :  { %v254_v33 = vmax.f32 %v249_v31, %v253_v32 }
 0x13a   :  { %v255_v34 = vpack.c.bf16 %v254_v33, %v254_v33 }
 0x13c   :  { %328 = vmatmul.bf16.vlgmr.msra.gmra.mxu2 %v255_v34  ;;  %v1347_v34 = vld [vmem:[#allocation6 + $0x48] sm:$0xff] }
 0x13d   :  { %v251_v35 = vpop.f32.mrf.mxu1  ;;  %550 = vmatpush.bf16.msrb.mxu0 %v1347_v34  ;;  %v688_v34 = vstv %s1113_s11 }
 0x13e   :  { %v1346_v35 = vld [vmem:[#allocation6 + $0x40] sm:$0xff] }
 0x141   :  { %551 = vmatpush.bf16.msrb.mxu0 %v1346_v35 }
 0x1bf   :  { %v329_v39 = vpop.f32.mrf.mxu2 }
 0x1c0   :  { %v335_v40 = vadd.f32 %v334_v38, %v329_v39  ;;  %1396 = vtanh.f32 %v329_v39  ;;  %v1360_v38 = vld [vmem:[#allocation8 + $0x70] sm:$0xff] }
 0x1c1   :  { %626 = vmatpush.bf16.msrb.mxu1 %v1360_v38  ;;  %v1364_v38 = vld [vmem:[#allocation5 + $0x90] sm:$0xff] }
 0x1c2   :  { %v336_v41 = vsel %vm333_vm0, %v335_v40, -1e+30  ;;  %v1358_v40 = vld [vmem:[#allocation8 + $0x60] sm:$0xff]  ;;  %774 = vmatpush.bf16.msrb.mxu2 %v1364_v38 }
 0x1c3   :  { %337 = vmax.xlane.f32.xlu0 %v336_v41 }
 0x1c6   :  { %v1397_v61 = vpop.eup %1396 }
 0x1c7   :  { %v331_v42 = vpop.f32.mrf.mxu2  ;;  %v362_v0 = vmul.f32 %v1397_v61, %v361_v62 }
 0x1c9   :  { %v364_v4 = vadd.f32 %v363_v1, %v362_v0 }
 0x236   :  { %v338_v43 = vpop.xlane.xlu0 %337 }
 0x237   :  { %vm339_vm1 = vcmp.ge.f32.partialorder %v336_v41, %v338_v43  ;;  %v1357_v41 = vld [vmem:[#allocation8 + $0x58] sm:$0xff] }
 0x238   :  { %v340_v44 = vsel %vm339_vm1, %v1564_v37, 128 }
 0x239   :  { %v342_v45 = vshra.s32 %v340_v44, 16  ;;  %v341_v48 = vand.u32 65535, %v340_v44 }
 0x23b   :  { %v344_v46 = vcvt.s32.f32 %v342_v45  ;;  %v343_v50 = vcvt.s32.f32 %v341_v48  ;;  %v1354_v48 = vld [vmem:[#allocation8 + $0x40] sm:$0xff] }
 0x23d   :  { %345 = vmin.xlane.f32.xlu0 %v344_v46 }
 0x2b0   :  { %v346_v49 = vpop.xlane.xlu0 %345 }
 0x2b1   :  { %vm347_vm2 = vcmp.eq.f32.partialorder %v344_v46, %v346_v49  ;;  %v352_v53 = vcvt.f32.s32 %v346_v49 }
 0x2b2   :  { %v348_v51 = vsel %vm347_vm2, %v343_v50, inf }
 0x2b3   :  { %349 = vmin.xlane.f32.xlu1 %v348_v51  ;;  %v353_v55 = vshll.u32 %v352_v53, 16 }
 0x2cc   :  { %371 = vperm.xlu1 %1393, %v355_v52  }
 0x326   :  { %v350_v54 = vpop.xlane.xlu1 %349 }
 0x327   :  { %v351_v56 = vcvt.f32.s32 %v350_v54  ;;  %v1210_v54 = vld [vmem:[%s1623_s2 + $0x8] sm:$0xff] }
 0x329   :  { %v354_v57 = vadd.s32 %v353_v55, %v351_v56 }
 0x32b   :  { %v358_v58 = vadd.s32 10, %v354_v57  ;;  %v356_v63 = vadd.s32 5, %v354_v57 }
 0x32d   :  { %vm359_vm3 = vcmp.eq.s32.totalorder %v1564_v37, %v358_v58  ;;  %vm357_vm4 = vcmp.eq.s32.totalorder %v1564_v37, %v356_v63 }
 0x32e   :  { %v366_v59 = vsel %vm359_vm3, %v329_v39, -1e+30  ;;  %v365_v6 = vsel %vm357_vm4, %v364_v4, 0.0  ;;  %v1359_v39 = vld [vmem:[#allocation8 + $0x68] sm:$0xff] }
 0x32f   :  { %v367_v60 = vmul.f32 1.442695, %v366_v59  ;;  %627 = vmatpush.bf16.msrb.mxu1 %v1359_v39  ;;  %v1363_v39 = vld [vmem:[#allocation5 + $0x88] sm:$0xff] }
 0x330   :  { %775 = vmatpush.bf16.msrb.mxu2 %v1363_v39 }
 0x331   :  { %1398 = vpow2.f32 %v367_v60 }
 0x333   :  { %628 = vmatpush.bf16.msrb.mxu1 %v1358_v40  ;;  %v1362_v40 = vld [vmem:[#allocation5 + $0x80] sm:$0xff] }
 0x334   :  { %776 = vmatpush.bf16.msrb.mxu2 %v1362_v40 }
 0x337   :  { %v1399_v2 = vpop.eup %1398  ;;  %629 = vmatpush.bf16.msrb.mxu1 %v1357_v41  ;;  %v1377_v41 = vld [vmem:[#allocation6 + $0xb8] sm:$0xff] }
 0x338   :  { %850 = vmatpush.bf16.msrb.mxu3 %v1377_v41  ;;  %v992_v41 = vstv %s1214_s15 }
 0x33e   :  { %v372_v3 = vpop.permute.xlu1 %371 }
 0x33f   :  { %v374_v5 = vmul.f32 %v1399_v2, %v372_v3 }
 0x341   :  { %v375_v7 = vadd.f32 %v374_v5, %v365_v6 }
 0x343   :  { %376 = vadd.xlane.f32.xlu2 %v375_v7 }
 0x3b6   :  { %v377_v16 = vpop.xlane.xlu2 %376 }
 0x3b7   :  { %v379_v17 = vadd.f32 %v378_v12, %v377_v16  ;;  %v667_v12 = vstv %s1110_s8  ;;  %v669_v16 = vstv %s1111_s9 }
 0x3b9   :  { %v381_v19 = vmax.f32 %v380_v15, %v379_v17 }
 0x3bb   :  { %v383_v20 = vmin.f32 %v382_v18, %v381_v19 }
 0x3bd   :  { %387 = vperm.xlu2 %1394, %v383_v20  }
 0x3c5   :  { %677 = vperm.xlu2 %1394, %v1581_v21   ;;  %v1374_v21 = vld [vmem:[#allocation6 + $0xa0] sm:$0xff] }
 0x417   :  { %v388_v31 = vpop.permute.xlu2 %387 }
 0x418   :  { %v1586_v32 = vsel %vm384_vm5, %v388_v31, %v1560_v14  ;;  %v1356_v14 = vld [vmem:[#allocation8 + $0x50] sm:$0xff] }
 0x419   :  { %v397_v33 = vpack.c.bf16 %v1586_v32, %v1586_v32  ;;  %630 = vmatpush.bf16.msrb.mxu1 %v1356_v14  ;;  %v1376_v14 = vld [vmem:[#allocation6 + $0xb0] sm:$0xff] }
 0x41a   :  { %851 = vmatpush.bf16.msrb.mxu3 %v1376_v14 }
 0x41b   :  { %471 = vmatmul.bf16.vlgmr.msra.gmra.mxu3 %v397_v33 }
 0x41d   :  { %631 = vmatpush.bf16.msrb.mxu1 %v1355_v47 }
 0x41f   :  { %v678_v18 = vpop.permute.xlu2 %677 }
 0x421   :  { %632 = vmatpush.bf16.msrb.mxu1 %v1354_v48  ;;  %v1371_v48 = vld [vmem:[#allocation6 + $0x88] sm:$0xff] }
 0x49e   :  { %v472_v42 = vpop.f32.mrf.mxu3 }
 0x49f   :  { %v476_v43 = vmul.f32 0.01, %v472_v42 }
 0x4a1   :  { %v477_v44 = vmax.f32 %v472_v42, %v476_v43  ;;  %v1375_v42 = vld [vmem:[#allocation6 + $0xa8] sm:$0xff]  ;;  %v1373_v43 = vld [vmem:[#allocation6 + $0x98] sm:$0xff] }
 0x4a2   :  { %852 = vmatpush.bf16.msrb.mxu3 %v1375_v42 }
 0x4a3   :  { %v478_v45 = vpack.c.bf16 %v477_v44, %v477_v44  ;;  %v1372_v44 = vld [vmem:[#allocation6 + $0x90] sm:$0xff] }
 0x4a5   :  { %552 = vmatmul.bf16.vlgmr.msrb.gmra.mxu0 %v478_v45 }
 0x4a6   :  { %v474_v46 = vpop.f32.mrf.mxu3  ;;  %853 = vmatpush.bf16.msrb.mxu3 %v1374_v21  ;;  %v994_v21 = vstv %s1215_s16 }
 0x4aa   :  { %854 = vmatpush.bf16.msrb.mxu3 %v1373_v43 }
 0x4ae   :  { %855 = vmatpush.bf16.msrb.mxu3 %v1372_v44 }
 0x4b2   :  { %856 = vmatpush.bf16.msrb.mxu3 %v1371_v48 }
 0x522   :  { %v553_v49 = vpop.f32.mrf.mxu0 }
 0x523   :  { %v557_v50 = vmul.f32 0.01, %v553_v49 }
 0x525   :  { %v558_v51 = vmax.f32 %v553_v49, %v557_v50  ;;  %v1370_v49 = vld [vmem:[#allocation6 + $0x80] sm:$0xff]  ;;  %v1385_v50 = vld [vmem:[#allocation8 + $0xb8] sm:$0xff] }
 0x526   :  { %857 = vmatpush.bf16.msrb.mxu3 %v1370_v49  ;;  %931 = vmatpush.bf16.msra.mxu0 %v1385_v50 }
 0x527   :  { %v559_v52 = vpack.c.bf16 %v558_v51, %v558_v51  ;;  %v1384_v51 = vld [vmem:[#allocation8 + $0xb0] sm:$0xff] }
 0x529   :  { %633 = vmatmul.bf16.vlgmr.msrb.gmra.mxu1 %v559_v52  ;;  %v1383_v52 = vld [vmem:[#allocation8 + $0xa8] sm:$0xff] }
 0x52a   :  { %v555_v53 = vpop.f32.mrf.mxu0  ;;  %932 = vmatpush.bf16.msra.mxu0 %v1384_v51 }
 0x52b   :  { %v1382_v53 = vld [vmem:[#allocation8 + $0xa0] sm:$0xff] }
 0x52e   :  { %933 = vmatpush.bf16.msra.mxu0 %v1383_v52 }
 0x532   :  { %934 = vmatpush.bf16.msra.mxu0 %v1382_v53 }
 0x5a6   :  { %v634_v55 = vpop.f32.mrf.mxu1 }
 0x5a7   :  { %v640_v56 = vadd.f32 %v1210_v54, %v634_v55  ;;  %1400 = vtanh.f32 %v634_v55  ;;  %v1381_v54 = vld [vmem:[#allocation8 + $0x98] sm:$0xff] }
 0x5a8   :  { %935 = vmatpush.bf16.msra.mxu0 %v1381_v54 }
 0x5a9   :  { %v641_v57 = vsel %vm333_vm0, %v640_v56, -1e+30 }
 0x5aa   :  { %642 = vmax.xlane.f32.xlu0 %v641_v57 }
 0x5ad   :  { %v1401_v11 = vpop.eup %1400 }
 0x5ae   :  { %v636_v58 = vpop.f32.mrf.mxu1  ;;  %v668_v15 = vmul.f32 %v1401_v11, %v667_v12 }
 0x5b0   :  { %v670_v19 = vadd.f32 %v669_v16, %v668_v15 }
 0x61d   :  { %v643_v59 = vpop.xlane.xlu0 %642 }
 0x61e   :  { %vm644_vm6 = vcmp.ge.f32.partialorder %v641_v57, %v643_v59 }
 0x61f   :  { %v645_v60 = vsel %vm644_vm6, %v1564_v37, 128 }
 0x620   :  { %v647_v61 = vshra.s32 %v645_v60, 16  ;;  %v646_v63 = vand.u32 65535, %v645_v60  ;;  %v1379_v60 = vld [vmem:[#allocation8 + $0x88] sm:$0xff] }
 0x622   :  { %v649_v62 = vcvt.s32.f32 %v647_v61  ;;  %v648_v1 = vcvt.s32.f32 %v646_v63  ;;  %v1378_v61 = vld [vmem:[#allocation8 + $0x80] sm:$0xff] }
 0x624   :  { %650 = vmin.xlane.f32.xlu0 %v649_v62 }
 0x697   :  { %v651_v0 = vpop.xlane.xlu0 %650 }
 0x698   :  { %vm652_vm7 = vcmp.eq.f32.partialorder %v649_v62, %v651_v0  ;;  %v657_v3 = vcvt.f32.s32 %v651_v0 }
 0x699   :  { %v653_v2 = vsel %vm652_vm7, %v648_v1, inf }
 0x69a   :  { %654 = vmin.xlane.f32.xlu0 %v653_v2  ;;  %v658_v5 = vshll.u32 %v657_v3, 16  ;;  %v1312_v3 = vld [vmem:[%s1623_s2 + $0x10] sm:$0xff]  ;;  %s1212_s2 = sld [smem:[#allocation2 + $0x8]] }
 0x6a0   :  { %v973_v28 = vstv %s1212_s2 }
 0x70d   :  { %v655_v4 = vpop.xlane.xlu0 %654 }
 0x70e   :  { %v656_v6 = vcvt.f32.s32 %v655_v4 }
 0x710   :  { %v659_v7 = vadd.s32 %v658_v5, %v656_v6 }
 0x712   :  { %v664_v8 = vadd.s32 10, %v659_v7  ;;  %v662_v13 = vadd.s32 5, %v659_v7 }
 0x714   :  { %vm665_vm8 = vcmp.eq.s32.totalorder %v1564_v37, %v664_v8  ;;  %vm663_vm9 = vcmp.eq.s32.totalorder %v1564_v37, %v662_v13  ;;  %v1313_v8 = vld [vmem:[%s1624_s3 + $0x10] sm:$0xff]  ;;  %s1213_s3 = sld [smem:[#allocation2 + $0x9]] }
 0x715   :  { %v672_v9 = vsel %vm665_vm8, %v634_v55, -1e+30  ;;  %v671_v22 = vsel %vm663_vm9, %v670_v19, 0.0  ;;  %v990_v40 = vmul.f32 0.01001, %v1313_v8 }
 0x716   :  { %v673_v10 = vmul.f32 1.442695, %v672_v9 }
 0x718   :  { %1402 = vpow2.f32 %v673_v10 }
 0x71e   :  { %v1403_v17 = vpop.eup %1402 }
 0x71f   :  { %v680_v20 = vmul.f32 %v1403_v17, %v678_v18 }
 0x721   :  { %v681_v23 = vadd.f32 %v680_v20, %v671_v22 }
 0x723   :  { %682 = vadd.xlane.f32.xlu1 %v681_v23 }
 0x796   :  { %v683_v31 = vpop.xlane.xlu1 %682 }
 0x797   :  { %v685_v33 = vadd.f32 %v684_v29, %v683_v31  ;;  %v975_v31 = vstv %s1213_s3 }
 0x799   :  { %v687_v35 = vmax.f32 %v686_v30, %v685_v33 }
 0x79b   :  { %v689_v36 = vmin.f32 %v688_v34, %v687_v35 }
 0x79d   :  { %693 = vperm.xlu0 %1395, %v689_v36  }
 0x80f   :  { %v694_v45 = vpop.permute.xlu0 %693 }
 0x810   :  { %v1601_v46 = vsel %vm690_vm10, %v694_v45, %v1586_v32  ;;  %v1380_v32 = vld [vmem:[#allocation8 + $0x90] sm:$0xff] }
 0x811   :  { %v703_v47 = vpack.c.bf16 %v1601_v46, %v1601_v46  ;;  %936 = vmatpush.bf16.msra.mxu0 %v1380_v32 }
 0x813   :  { %777 = vmatmul.bf16.vlgmr.msrb.gmra.mxu2 %v703_v47 }
 0x815   :  { %937 = vmatpush.bf16.msra.mxu0 %v1379_v60 }
 0x819   :  { %938 = vmatpush.bf16.msra.mxu0 %v1378_v61 }
 0x896   :  { %v778_v55 = vpop.f32.mrf.mxu2 }
 0x897   :  { %v782_v56 = vmul.f32 0.01, %v778_v55 }
 0x899   :  { %v783_v57 = vmax.f32 %v778_v55, %v782_v56 }
 0x89b   :  { %v784_v58 = vpack.c.bf16 %v783_v57, %v783_v57 }
 0x89d   :  { %858 = vmatmul.bf16.vlgmr.msrb.gmra.mxu3 %v784_v58 }
 0x89e   :  { %v780_v59 = vpop.f32.mrf.mxu2 }
 0x920   :  { %v859_v62 = vpop.f32.mrf.mxu3 }
 0x921   :  { %v863_v63 = vmul.f32 0.01, %v859_v62 }
 0x923   :  { %v864_v0 = vmax.f32 %v859_v62, %v863_v63 }
 0x925   :  { %v865_v1 = vpack.c.bf16 %v864_v0, %v864_v0 }
 0x927   :  { %939 = vmatmul.bf16.vlgmr.msra.gmra.mxu0 %v865_v1 }
 0x928   :  { %v861_v2 = vpop.f32.mrf.mxu3 }
 0x9a4   :  { %v940_v4 = vpop.f32.mrf.mxu0 }
 0x9a5   :  { %v946_v5 = vadd.f32 %v1312_v3, %v940_v4  ;;  %1404 = vtanh.f32 %v940_v4 }
 0x9a7   :  { %v947_v6 = vsel %vm333_vm0, %v946_v5, -1e+30 }
 0x9a8   :  { %948 = vmax.xlane.f32.xlu2 %v947_v6 }
 0x9ab   :  { %v1405_v27 = vpop.eup %1404 }
 0x9ac   :  { %v942_v7 = vpop.f32.mrf.mxu0  ;;  %v974_v30 = vmul.f32 %v1405_v27, %v973_v28 }
 0x9ae   :  { %v976_v35 = vadd.f32 %v975_v31, %v974_v30 }
 0x9c0   :  { %983 = vperm.xlu2 %1394, %v1313_v8  }
 0xa1b   :  { %v949_v9 = vpop.xlane.xlu2 %948 }
 0xa1c   :  { %vm950_vm11 = vcmp.ge.f32.partialorder %v947_v6, %v949_v9 }
 0xa1d   :  { %v951_v10 = vsel %vm950_vm11, %v1564_v37, 128 }
 0xa1e   :  { %v953_v11 = vshra.s32 %v951_v10, 16  ;;  %v952_v13 = vand.u32 65535, %v951_v10 }
 0xa20   :  { %v955_v12 = vcvt.s32.f32 %v953_v11  ;;  %v954_v16 = vcvt.s32.f32 %v952_v13 }
 0xa22   :  { %956 = vmin.xlane.f32.xlu1 %v955_v12 }
 0xa23   :  { %v984_v34 = vpop.permute.xlu2 %983 }
 0xa95   :  { %v957_v15 = vpop.xlane.xlu1 %956 }
 0xa96   :  { %vm958_vm12 = vcmp.eq.f32.partialorder %v955_v12, %v957_v15  ;;  %v963_v18 = vcvt.f32.s32 %v957_v15 }
 0xa97   :  { %v959_v17 = vsel %vm958_vm12, %v954_v16, inf }
 0xa98   :  { %960 = vmin.xlane.f32.xlu0 %v959_v17  ;;  %v964_v20 = vshll.u32 %v963_v18, 16 }
 0xb0b   :  { %v961_v19 = vpop.xlane.xlu0 %960 }
 0xb0c   :  { %v962_v22 = vcvt.f32.s32 %v961_v19 }
 0xb0e   :  { %v965_v23 = vadd.s32 %v964_v20, %v962_v22 }
 0xb10   :  { %v970_v24 = vadd.s32 10, %v965_v23  ;;  %v968_v29 = vadd.s32 5, %v965_v23 }
 0xb12   :  { %vm971_vm13 = vcmp.eq.s32.totalorder %v1564_v37, %v970_v24  ;;  %vm969_vm14 = vcmp.eq.s32.totalorder %v1564_v37, %v968_v29 }
 0xb13   :  { %v978_v25 = vsel %vm971_vm13, %v940_v4, -1e+30  ;;  %v977_v38 = vsel %vm969_vm14, %v976_v35, 0.0 }
 0xb14   :  { %v979_v26 = vmul.f32 1.442695, %v978_v25 }
 0xb16   :  { %1406 = vpow2.f32 %v979_v26 }
 0xb1c   :  { %v1407_v33 = vpop.eup %1406 }
 0xb1d   :  { %v986_v36 = vmul.f32 %v1407_v33, %v984_v34 }
 0xb1f   :  { %v987_v39 = vadd.f32 %v986_v36, %v977_v38 }
 0xb21   :  { %988 = vadd.xlane.f32.xlu1 %v987_v39 }
 0xb94   :  { %v989_v14 = vpop.xlane.xlu1 %988 }
 0xb95   :  { %v991_v42 = vadd.f32 %v990_v40, %v989_v14 }
 0xb97   :  { %v993_v43 = vmax.f32 %v992_v41, %v991_v42 }
 0xb99   :  { %v995_v44 = vmin.f32 %v994_v21, %v993_v43 }
 0xb9b   :  { %999 = vperm.xlu1 %1393, %v995_v44  }
 0xc0d   :  { %v1000_v45 = vpop.permute.xlu1 %999 }
 0xc0e   :  { %v1002_v47 = vsel %vm996_vm15, %v1000_v45, %v1601_v46 }
 0xc0f   :  { %1003 = vst [vmem:[%s1628_s7] sm:$0xff] %v1002_v47 }
 0xc10   :  { %1008 = vsyncpa [#allocation3], 1 }
 0xc11   :  { %1009 = vsyncpa [#allocation7], 1 }
 0xc12   :  { %1010 = vsyncpa [#allocation4], 1 }

</bundles_post_ra>
